<compile_context>
chip_gen: v6e
topology: v6e:2x2x1
jax: 0.10.0
libtpu: 0.0.40
codegen_flags: <defaults>
</compile_context>

<pallas_src>
import jax
import jax.numpy as jnp
import numpy as np
from jax.experimental import pallas as pl
from jax.experimental.pallas import tpu as pltpu

# Module constants (from the reference script)
FEATURE_DIM = 60 + 1 + 1                       # 62
TIME_DIM = np.linspace(0.1, 5, 50).shape[0]    # 50
INPUT_DIM = TIME_DIM * FEATURE_DIM             # 3100
HIDDEN = 100


def _round_up(n, m):
    return ((n + m - 1) // m) * m


def mepnet_kernel(x_ref, w1_ref, b1_ref, w23_ref, b23_ref, o_ref):
    # fc1: x is read from HBM in its original dtype and cast to bf16 in VMEM
    # (no padded HBM copy); bf16 MXU operands, f32 accumulation; bias + tanh
    # in f32.
    x = x_ref[...].astype(jnp.bfloat16)
    h1 = jnp.dot(x, w1_ref[...], preferred_element_type=jnp.float32)
    h1 = jnp.tanh(h1 + b1_ref[...])                                   # (tb, 128) f32

    # fused fc2+fc3:  (h1 @ W2 + b2) @ W3  ==  h1 @ (W2 @ W3) + b2 @ W3
    z = jnp.dot(h1.astype(jnp.bfloat16), w23_ref[...],
                preferred_element_type=jnp.float32) + b23_ref[...]    # (tb, 128) f32

    # softplus, numerically stable single-exp form (matches PyTorch softplus
    # with beta=1, threshold=20 to f32 precision).
    o_ref[...] = jnp.maximum(z, 0.0) + jnp.log1p(jnp.exp(-jnp.abs(z)))


def prepare_params(w1, b1, w2, b2, w3):
    """One-time parameter prep (hoisted out of the per-call path).

    Expects weights already in (in, out) layout:
      w1: (input_dim, 100)   w2: (100, 100)   w3: (100, time_dim)
      b1, b2: (100,) or (1, 100)
    Returns a dict of padded/cast arrays + dims for `mepnet_forward`.
    """
    in_dim, hid = w1.shape
    time_dim = w3.shape[1]
    h_pad = _round_up(hid, 128)
    t_pad = _round_up(time_dim, 128)

    w1 = jnp.asarray(w1, jnp.float32)
    b1 = jnp.asarray(b1, jnp.float32).reshape(-1)
    w2 = jnp.asarray(w2, jnp.float32)
    b2 = jnp.asarray(b2, jnp.float32).reshape(-1)
    w3 = jnp.asarray(w3, jnp.float32)

    # Algebraic fusion of fc2 into fc3 (done in f32, once).
    w23 = w2 @ w3                                   # (hid, time_dim)
    b23 = b2 @ w3                                   # (time_dim,)

    # Zero padding => bit-exact contributions from padded rows/cols.
    w1p = jnp.zeros((in_dim, h_pad), jnp.bfloat16).at[:, :hid].set(
        w1.astype(jnp.bfloat16))
    b1p = jnp.zeros((1, h_pad), jnp.float32).at[0, :hid].set(b1)
    w23p = jnp.zeros((h_pad, t_pad), jnp.bfloat16).at[:hid, :time_dim].set(
        w23.astype(jnp.bfloat16))
    b23p = jnp.zeros((1, t_pad), jnp.float32).at[0, :time_dim].set(b23)

    return dict(w1p=w1p, b1p=b1p, w23p=w23p, b23p=b23p,
                in_dim=in_dim, hid=hid, time_dim=time_dim,
                h_pad=h_pad, t_pad=t_pad)


def mepnet_forward(x, params, *, tb=256):
    """Forward pass.

    x      : (B, time_dim, feature_dim) or (B, input_dim); f32 (or bf16).
    params : output of prepare_params().
    tb     : batch tile.  Default 256 is v5e-safe (~9 MB VMEM); 512 is a good
             throughput choice on v6e/v7x.
    """
    in_dim = params["in_dim"]
    hid = params["hid"]
    time_dim = params["time_dim"]
    h_pad = params["h_pad"]
    t_pad = params["t_pad"]

    B = x.shape[0]
    x2d = x.reshape(B, -1)
    assert x2d.shape[1] == in_dim
    if x2d.dtype != jnp.bfloat16 and x2d.dtype != jnp.float32:
        x2d = x2d.astype(jnp.float32)

    # Keep the batch dim a multiple of 8 (sublane); only copies in the rare
    # ragged case.
    Bp = _round_up(B, 8)
    if Bp != B:
        x2d = jnp.concatenate(
            [x2d, jnp.zeros((Bp - B, in_dim), x2d.dtype)], axis=0)

    # Batch tile: multiple of 8; prefer >= 2 grid steps so the x DMA is
    # double-buffered and the batch axis can shard across TensorCores (v7x).
    tb = max(8, (min(tb, Bp) // 8) * 8)
    if pl.cdiv(Bp, tb) < 2 and Bp > 8:
        tb = _round_up(pl.cdiv(Bp, 2), 8)
    n_steps = pl.cdiv(Bp, tb)

    itemsize = jnp.dtype(x2d.dtype).itemsize
    cost = pl.CostEstimate(
        flops=2 * Bp * (in_dim * hid + hid * time_dim),
        transcendentals=Bp * (hid + 2 * time_dim),          # tanh + exp/log1p
        bytes_accessed=(Bp * in_dim * itemsize
                        + params["w1p"].size * 2 + params["w23p"].size * 2
                        + (params["b1p"].size + params["b23p"].size) * 4
                        + Bp * t_pad * 4),
    )

    const = lambda shape: pl.BlockSpec(shape, lambda i: (0, 0))

    out_full = pl.pallas_call(
        mepnet_kernel,
        out_shape=jax.ShapeDtypeStruct((Bp, t_pad), jnp.float32),
        grid=(n_steps,),
        in_specs=[
            pl.BlockSpec((tb, in_dim), lambda i: (i, 0)),   # x: tiled over batch, full K
            const((in_dim, h_pad)),                         # W1 (VMEM-resident)
            const((1, h_pad)),                              # b1
            const((h_pad, t_pad)),                          # W23 = W2 @ W3
            const((1, t_pad)),                              # b23 = b2 @ W3
        ],
        out_specs=pl.BlockSpec((tb, t_pad), lambda i: (i, 0)),
        compiler_params=pltpu.CompilerParams(
            dimension_semantics=("parallel",)),
        cost_estimate=cost,
    )(x2d, params["w1p"], params["b1p"], params["w23p"], params["b23p"])

    return out_full[:B, :time_dim]


def init_params(key):
    """Deterministic init mimicking PyTorch nn.Linear default U(-1/sqrt(fan_in), ...).
    Weights returned already transposed to (in, out)."""
    k1, k2, k3, k4, k5 = jax.random.split(key, 5)

    def u(k, shape, fan_in):
        bound = 1.0 / np.sqrt(fan_in)
        return jax.random.uniform(k, shape, jnp.float32, -bound, bound)

    w1 = u(k1, (INPUT_DIM, HIDDEN), INPUT_DIM)
    b1 = u(k2, (1, HIDDEN), INPUT_DIM)
    w2 = u(k3, (HIDDEN, HIDDEN), HIDDEN)
    b2 = u(k4, (1, HIDDEN), HIDDEN)
    w3 = u(k5, (HIDDEN, TIME_DIM), HIDDEN)
    return w1, b1, w2, b2, w3


def reference_forward_f32(x, w1, b1, w2, b2, w3):
    """Pure-JAX f32 reference of the PyTorch forward (unfused)."""
    x2d = x.reshape(x.shape[0], -1)
    h1 = jnp.tanh(x2d @ w1 + jnp.asarray(b1, jnp.float32).reshape(-1))
    h2 = h1 @ w2 + jnp.asarray(b2, jnp.float32).reshape(-1)
    z = h2 @ w3
    return jnp.maximum(z, 0.0) + jnp.log1p(jnp.exp(-jnp.abs(z)))


def reference_forward_kernel_math(x, w1, b1, w2, b2, w3):
    """Pure-JAX reference mirroring the kernel math: fused W2@W3 (f32) and
    bf16 matmul operands with f32 accumulation."""
    x2d = x.reshape(x.shape[0], -1)
    w23 = jnp.asarray(w2, jnp.float32) @ jnp.asarray(w3, jnp.float32)
    b23 = jnp.asarray(b2, jnp.float32).reshape(-1) @ jnp.asarray(w3, jnp.float32)
    h1 = jnp.dot(x2d.astype(jnp.bfloat16), w1.astype(jnp.bfloat16),
                 preferred_element_type=jnp.float32)
    h1 = jnp.tanh(h1 + jnp.asarray(b1, jnp.float32).reshape(-1))
    z = jnp.dot(h1.astype(jnp.bfloat16), w23.astype(jnp.bfloat16),
                preferred_element_type=jnp.float32) + b23
    return jnp.maximum(z, 0.0) + jnp.log1p(jnp.exp(-jnp.abs(z)))


if __name__ == "__main__":
    key = jax.random.PRNGKey(0)
    kx, kp = jax.random.split(key)

    # Small batch; time/feature dims fixed by the module definition (50 x 62).
    B = 32
    x = jax.random.normal(kx, (B, TIME_DIM, FEATURE_DIM), dtype=jnp.float32)
    w1, b1, w2, b2, w3 = init_params(kp)

    # One-time weight prep (padded bf16 weights + fused fc2/fc3), hoisted out
    # of the per-call path.
    params = prepare_params(w1, b1, w2, b2, w3)

    # Default tb auto-shrinks to 16 here -> grid=(2,): pipelined x tiles and a
    # "parallel" batch axis for megacore sharding.
    out = mepnet_forward(x, params)
    out = jax.block_until_ready(out)

    # Tight check vs. a pure-JAX reference using the same fused/bf16 math.
    ref_k = reference_forward_kernel_math(x, w1, b1, w2, b2, w3)
    np.testing.assert_allclose(np.asarray(out), np.asarray(ref_k),
                               rtol=5e-3, atol=5e-3)

    # Loose sanity check vs. the full-f32 PyTorch-equivalent reference.
    ref_f32 = reference_forward_f32(x, w1, b1, w2, b2, w3)
    np.testing.assert_allclose(np.asarray(out), np.asarray(ref_f32),
                               rtol=5e-2, atol=5e-2)

    assert out.shape == (B, TIME_DIM)
    print("KERNEL_OK")
</pallas_src>

<mosaic_0001>
module attributes {stable_mosaic.version = 11 : i64} {
  func.func @mepnet_kernel(%arg0: i32, %arg1: memref<16x3100xf32, #tpu.memory_space<vmem>>, %arg2: memref<3100x128xbf16, #tpu.memory_space<vmem>>, %arg3: memref<1x128xf32, #tpu.memory_space<vmem>>, %arg4: memref<128x128xbf16, #tpu.memory_space<vmem>>, %arg5: memref<1x128xf32, #tpu.memory_space<vmem>>, %arg6: memref<16x128xf32, #tpu.memory_space<vmem>>) attributes {dimension_semantics = [#tpu.dimension_semantics<parallel>], iteration_bounds = array<i64: 2>, scalar_prefetch = 0 : i64, scratch_operands = 0 : i64, tpu.core_type = #tpu.core_type<tc>, window_params = [{transform_indices = @transform_0, window_bounds = array<i64: 16, 3100>}, {pipeline_mode = #tpu.pipeline_mode<synchronous>, transform_indices = @transform_1, window_bounds = array<i64: 3100, 128>}, {pipeline_mode = #tpu.pipeline_mode<synchronous>, transform_indices = @transform_2, window_bounds = array<i64: 1, 128>}, {pipeline_mode = #tpu.pipeline_mode<synchronous>, transform_indices = @transform_3, window_bounds = array<i64: 128, 128>}, {pipeline_mode = #tpu.pipeline_mode<synchronous>, transform_indices = @transform_4, window_bounds = array<i64: 1, 128>}, {transform_indices = @transform_5, window_bounds = array<i64: 16, 128>}]} {
    %c0 = arith.constant 0 : index
    %c0_0 = arith.constant 0 : index
    %0 = vector.load %arg1[%c0, %c0_0] : memref<16x3100xf32, #tpu.memory_space<vmem>>, vector<16x3100xf32>
    %1 = arith.truncf %0 : vector<16x3100xf32> to vector<16x3100xbf16>
    %c0_1 = arith.constant 0 : index
    %c0_2 = arith.constant 0 : index
    %2 = vector.load %arg2[%c0_1, %c0_2] : memref<3100x128xbf16, #tpu.memory_space<vmem>>, vector<3100x128xbf16>
    %cst = arith.constant dense<0.000000e+00> : vector<16x128xf32>
    %3 = tpu.matmul %1, %2, %cst {dimension_numbers = #tpu.dot_dimension_numbers<[1], [0], [0], [1], [0, 0, 1, 1], [], []>} : vector<16x3100xbf16>, vector<3100x128xbf16>, vector<16x128xf32> -> vector<16x128xf32>
    %c0_3 = arith.constant 0 : index
    %c0_4 = arith.constant 0 : index
    %4 = vector.load %arg3[%c0_3, %c0_4] : memref<1x128xf32, #tpu.memory_space<vmem>>, vector<1x128xf32>
    %5 = vector.broadcast %4 : vector<1x128xf32> to vector<16x128xf32>
    %6 = arith.addf %3, %5 : vector<16x128xf32>
    %7 = math.tanh %6 : vector<16x128xf32>
    %8 = arith.truncf %7 : vector<16x128xf32> to vector<16x128xbf16>
    %c0_5 = arith.constant 0 : index
    %c0_6 = arith.constant 0 : index
    %9 = vector.load %arg4[%c0_5, %c0_6] : memref<128x128xbf16, #tpu.memory_space<vmem>>, vector<128x128xbf16>
    %cst_7 = arith.constant dense<0.000000e+00> : vector<16x128xf32>
    %10 = tpu.matmul %8, %9, %cst_7 {dimension_numbers = #tpu.dot_dimension_numbers<[1], [0], [0], [1], [0, 0, 1, 1], [], []>} : vector<16x128xbf16>, vector<128x128xbf16>, vector<16x128xf32> -> vector<16x128xf32>
    %c0_8 = arith.constant 0 : index
    %c0_9 = arith.constant 0 : index
    %11 = vector.load %arg5[%c0_8, %c0_9] : memref<1x128xf32, #tpu.memory_space<vmem>>, vector<1x128xf32>
    %12 = vector.broadcast %11 : vector<1x128xf32> to vector<16x128xf32>
    %13 = arith.addf %10, %12 : vector<16x128xf32>
    %cst_10 = arith.constant 0.000000e+00 : f32
    %14 = vector.broadcast %cst_10 : f32 to vector<16x128xf32>
    %15 = arith.maximumf %13, %14 : vector<16x128xf32>
    %16 = math.absf %13 : vector<16x128xf32>
    %cst_11 = arith.constant 0.000000e+00 : f32
    %17 = vector.broadcast %cst_11 : f32 to vector<16x128xf32>
    %18 = arith.subf %17, %16 : vector<16x128xf32>
    %19 = math.exp %18 : vector<16x128xf32>
    %20 = math.log1p %19 : vector<16x128xf32>
    %21 = arith.addf %15, %20 : vector<16x128xf32>
    %c0_12 = arith.constant 0 : index
    %c0_13 = arith.constant 0 : index
    %22 = vector.load %arg6[%c0_12, %c0_13] : memref<16x128xf32, #tpu.memory_space<vmem>>, vector<16x128xf32>
    tpu.vector_store %arg6[%c0_12, %c0_13], %21 {strides = array<i32>} : memref<16x128xf32, #tpu.memory_space<vmem>>, vector<16x128xf32>,
    return
  }
  func.func @transform_0(%arg0: i32) -> (i32, i32) {
    %c0_i32 = arith.constant 0 : i32
    %c0_i32_0 = arith.constant 0 : i32
    return %arg0, %c0_i32 : i32, i32
  }
  func.func @transform_1(%arg0: i32) -> (i32, i32) {
    %c0_i32 = arith.constant 0 : i32
    %c0_i32_0 = arith.constant 0 : i32
    %c0_i32_1 = arith.constant 0 : i32
    return %c0_i32, %c0_i32_0 : i32, i32
  }
  func.func @transform_2(%arg0: i32) -> (i32, i32) {
    %c0_i32 = arith.constant 0 : i32
    %c0_i32_0 = arith.constant 0 : i32
    %c0_i32_1 = arith.constant 0 : i32
    return %c0_i32, %c0_i32_0 : i32, i32
  }
  func.func @transform_3(%arg0: i32) -> (i32, i32) {
    %c0_i32 = arith.constant 0 : i32
    %c0_i32_0 = arith.constant 0 : i32
    %c0_i32_1 = arith.constant 0 : i32
    return %c0_i32, %c0_i32_0 : i32, i32
  }
  func.func @transform_4(%arg0: i32) -> (i32, i32) {
    %c0_i32 = arith.constant 0 : i32
    %c0_i32_0 = arith.constant 0 : i32
    %c0_i32_1 = arith.constant 0 : i32
    return %c0_i32, %c0_i32_0 : i32, i32
  }
  func.func @transform_5(%arg0: i32) -> (i32, i32) {
    %c0_i32 = arith.constant 0 : i32
    %c0_i32_0 = arith.constant 0 : i32
    return %arg0, %c0_i32 : i32, i32
  }
}

</mosaic_0001>

<bundles_post_ra>
// kernel: tpu_custom_call.1
= control target key start
LH: loop header
LB: loop body
LE: loop exit
PB: predicated region body
PF: predicated region fallthrough
CT: control target
= control target key end

     0   :  { %10 = vsyncpa [#allocation3], 0  ;;  %s3961_s0 = inlined_call_operand.hbm [shape: f32[32,3100], index: 0, kind: input, shape index: {}]   ;;  %s3962_s1 = inlined_call_operand.hbm [shape: bf16[3100,128], index: 1, kind: input, shape index: {}]   ;;  %s3963_s2 = inlined_call_operand.vmem [shape: f32[1,128], index: 2, kind: input, shape index: {}]   ;;  %s3964_s3 = inlined_call_operand.hbm [shape: bf16[128,128], index: 3, kind: input, shape index: {}]   ;;  %s3965_s4 = inlined_call_operand.vmem [shape: f32[1,128], index: 4, kind: input, shape index: {}]   ;;  %s3966_s5 = inlined_call_operand.hbm [shape: f32[32,128], index: 5, kind: output, shape index: {}]  }
   0x1   :  { %12 = vsyncpa [#allocation3 + $0x1], 0 }
   0x2   :  { %13 = vsyncpa [#allocation6], 0 }
   0x3   :  { %14 = vsyncpa [#allocation4], 0 }
   0x4   :  { %16 = vsyncpa [#allocation4 + $0x1], 0  ;;  %s3714_s18 = smov 0   ;;  %s3716_s19 = smov 0  }
   0x5   :  { %s3718_s20 = smov 0   ;;  %s3720_s21 = smov 0  }
   0x6 LB: > { %s3735_s22 = sadd.s32 4294967295, %s3670_s21   ;;  %s2703_s23 = sadd.s32 4294967294, %s3670_s21   ;;  %s3670_s21 = sphi %s3720_s21, %s3988_s21   ;;  %s3666_s20 = sphi %s3718_s20, %s3987_s20   ;;  %s3662_s19 = sphi %s3716_s19, %s3986_s19   ;;  %s3658_s18 = sphi %s3714_s18, %s3985_s18  }
   0x7   : > { %p42_p0 = scmp.ne.s32.totalorder %s3662_s19, %s3658_s18  ;;  %p3967_p1 = scmp.eq.s32.totalorder %s3735_s22, 0 }
   0x8   : > { %p156_p3 = scmp.eq.s32.totalorder %s2703_s23, 1  ;;  %p2704_p5 = scmp.ge.s32.totalorder %s3670_s21, 1 }
   0x9   : > { %p3744_p4 = por %p3967_p1, %p42_p0  ;;  %p163_p7 = scmp.lt.s32.totalorder %s3670_s21, 3 }
   0xa   : > { %p3749_p6 = por %p156_p3, %p42_p0  ;;  %s3672_s27 = smov [#allocation5]  }
   0xb   : > { %s3971_s24 = scalar_select %p3744_p4, 1, 0 }
   0xc   : > { %s3972_s25 = scalar_select %p3749_p6, 1, 0 }
   0xd   : > { %p3754_p8 = pnand %p2704_p5, %p163_p7  ;;  %s175_s28 = sshll.u32 %s3672_s27, 4  ;;  %s176_s28 = int_to_ptr.vmem [resolvable:$true] %s175_s28 }
   0xe   : > { %s3673_s30 = smov [#allocation7]   ;;  %s3533_s7 = scalar_lea.vmem %s176_s28, 24832 }
   0xf   : > { %s3973_s26 = scalar_select %p3754_p8, 1, 0 }
  0x10   : > { %p3245_p9 = pneg %p3754_p8  ;;  %s191_s6 = sshll.u32 %s3673_s30, 4  ;;  %s192_s6 = int_to_ptr.vmem [resolvable:$true] %s191_s6 }
  0x11   : > { %p3534_p13 = scmp.ne.s32.totalorder %s176_s28, %s3533_s7  ;;  %p3541_p5 = scmp.lt.s32.totalorder %s176_s28, %s176_s28 }
  0x12   : > { %p3763_p11 = pnand %p3245_p9, %p3967_p1  ;;  %p3542_p7 = scmp.lt.s32.totalorder %s3533_s7, %s3533_s7 }
  0x14   : > { %p3524_p12 = pneg %p3763_p11  ;;  %p3543_p10 = por %p3542_p7, %p3541_p5 }
  0x16   : > { %p3536_p0 = pnand %p3534_p13, %p3524_p12 }
  0x18   : > { %p3537_p3 = pneg %p3536_p0 }
  0x1a   : > { %p3544_p9 = pnand %p3543_p10, %p3537_p3 }
  0x1c   : > { %3547 = shalt.err (!%p3544_p9)
}
  0x1d   : > { %s3674_s8 = smov 64   ;;  %s3675_s9 = smov 4  }
  0x1e   : > { %3248 = dma.hbm_to_vmem [thread:$0]  (!%p3763_p11), %s3962_s1, 24832, %s176_s28, [#allocation6], %s3674_s8, %s3674_s8, %s3675_s9  }
  0x1f   : > { %s3559_s12 = scalar_lea.vmem %s192_s6, 1024  ;;  %p3567_p2 = scmp.lt.s32.totalorder %s192_s6, %s192_s6 }
  0x20   : > { %p3560_p1 = scmp.ne.s32.totalorder %s192_s6, %s3559_s12  ;;  %p3568_p6 = scmp.lt.s32.totalorder %s3559_s12, %s3559_s12 }
  0x22   : > { %p3562_p13 = pnand %p3560_p1, %p3524_p12  ;;  %p3569_p5 = por %p3568_p6, %p3567_p2 }
  0x24   : > { %p3563_p0 = pneg %p3562_p13 }
  0x26   : > { %p3570_p10 = pnand %p3569_p5, %p3563_p0 }
  0x28   : > { %3573 = shalt.err (!%p3570_p10)
}
  0x29   : > { %3251 = dma.hbm_to_vmem [thread:$0]  (!%p3763_p11), %s3964_s3, 1024, %s192_s6, [#allocation6], %s3674_s8, %s3674_s8, %s3675_s9  }
  0x2a   : > { %s3786_s15 = sadd.s32 1, %s3670_s21   ;;  %s29_s16 = sadd.s32 1, %s3666_s20 }
  0x2b   : > { %s26_s17 = ssub.s32 %s3670_s21, %s3786_s15  ;;  %p36_p1 = scmp.ne.s32.totalorder %s3666_s20, %s3662_s19 }
  0x2c   : > { %p27_p2 = scmp.eq.s32.totalorder %s26_s17, 0  ;;  %p37_p6 = scmp.eq.s32.totalorder %s3670_s21, 0 }
  0x2d   : > { %p3975_p12 = scmp.eq.s32.totalorder %s3735_s22, 1  ;;  %p3262_p7 = scmp.lt.s32.totalorder %s3670_s21, 2 }
  0x2e   : > { %s3802_s27 = scalar_select %p27_p2, %s3666_s20, %s29_s16  }
  0x2f   : > { %p3796_p3 = por %p3975_p12, %p36_p1  ;;  %p38_p9 = por %p37_p6, %p36_p1 }
  0x30   : > { %s208_s28 = sand.u32 1, %s3666_s20   ;;  %s3231_s30 = smul.u32 6400, %s3670_s21 }
  0x31   : > { %s3976_s23 = scalar_select %p3796_p3, 1, 0 }
  0x32   : > { %s3230_s29 = smul.u32 400, %s208_s28  ;;  %p3806_p11 = pnand %p3262_p7, %p38_p9 }
  0x33   : > { %s3813_s9 = scalar_lea.hbm %s3961_s0, %s3231_s30  ;;  %s3817_s12 = scalar_lea.sflag [#allocation3], %s208_s28 }
  0x34   : > { %s212_s10 = scalar_lea.vmem [#allocation2], %s3230_s29  ;;  %s3574_s13 = scalar_lea.hbm %s3813_s9, 6400 }
  0x35   : > { %s220_s11 = sshll.u32 %s212_s10, 4  ;;  %p3575_p13 = scmp.ne.s32.totalorder %s3813_s9, %s3574_s13  ;;  %s3815_s11 = int_to_ptr.vmem [resolvable:$true] %s220_s11 }
  0x36   : > { %p3576_p0 = pneg %p3806_p11  ;;  %s3579_s17 = scalar_lea.hbm %s3961_s0, 12800 }
  0x37   : > { %p3580_p1 = scmp.lt.s32.totalorder %s3813_s9, %s3961_s0  ;;  %p3581_p2 = scmp.lt.s32.totalorder %s3579_s17, %s3574_s13 }
  0x38   : > { %p3577_p5 = pnand %p3576_p0, %p3575_p13 }
  0x39   : > { %p3582_p6 = por %p3581_p2, %p3580_p1 }
  0x3a   : > { %p3578_p10 = pneg %p3577_p5 }
  0x3c   : > { %p3583_p12 = pnand %p3582_p6, %p3578_p10 }
  0x3e   : > { %3586 = shalt.err (!%p3583_p12)
}
  0x3f   : > { %s3587_s28 = scalar_lea.vmem %s3815_s11, 6400  ;;  %s3676_s29 = smov [#allocation2]  }
  0x40   : > { %p3588_p7 = scmp.ne.s32.totalorder %s3815_s11, %s3587_s28  ;;  %s3592_s8 = sshll.u32 %s3676_s29, 4  ;;  %s3593_s8 = int_to_ptr.vmem [resolvable:$false] %s3592_s8 }
  0x41   : > { %s3594_s10 = scalar_lea.vmem %s3593_s8, 12800  ;;  %p3595_p5 = scmp.lt.s32.totalorder %s3815_s11, %s3593_s8 }
  0x42   : > { %p3590_p9 = pnand %p3588_p7, %p3576_p0  ;;  %p3596_p3 = scmp.lt.s32.totalorder %s3594_s10, %s3587_s28 }
  0x44   : > { %p3591_p13 = pneg %p3590_p9  ;;  %p3597_p4 = por %p3596_p3, %p3595_p5 }
  0x46   : > { %p3598_p8 = pnand %p3597_p4, %p3591_p13 }
  0x48   : > { %3601 = shalt.err (!%p3598_p8)
}
  0x49   : > { %s3677_s13 = smov 3200   ;;  %s3678_s14 = smov 200  }
  0x4a   : > { %3255 = dma.hbm_to_vmem [thread:$0]  (!%p3806_p11), %s3813_s9, 6400, %s3815_s11, %s3817_s12, %s3677_s13, %s3677_s13, %s3678_s14  }
  0x4b   : > { %p3978_p0 = scmp.ne.s32.totalorder %s3973_s26, 0 }
  0x4c   : > { %s3841_s16 = sand.u32 (!%p3978_p0), 1, %s3662_s19   ;;  %p3979_p4 = scmp.ne.s32.totalorder (!%p3978_p0), %s3971_s24, 0 }
  0x4d   : > { %232 = sbr.rel (%p3978_p0) target bundleno = 757 (0x2f5), region = 40  ;;  %s235_s30 = scalar_lea.sflag (!%p3978_p0), [#allocation3], %s3841_s16 }
  0x4e   : > { %s3232_s17 = smul.u32 (!%p3978_p0), 400, %s3841_s16 }
  0x50   : > { %s3845_s7 = scalar_lea.vmem (!%p3978_p0), [#allocation2], %s3232_s17 }
  0x52   : > { %3645 = dma.done.wait (%p3979_p4), %s235_s30, 6400  }
  0x53   : > { %3647 = vsyncadd (%p3979_p4), %s235_s30, 4294960896  ;;  %p3980_p8 = scmp.eq.s32.totalorder %s3735_s22, 0 }
  0x55   : > { %3649 = dma.done.wait (%p3980_p8), [#allocation6], 25856   ;;  %p3981_p3 = pmov %p3980_p8 }
  0x56   : > { %v3308_v0 = vld [vmem:[#allocation5 + $0x78] sm:$0xff]   ;;  %v3312_v4 = vld [vmem:[#allocation5 + $0x70] sm:$0xff]   ;;  %v3316_v8 = vld [vmem:[#allocation5 + $0x68] sm:$0xff]   ;;  %vm1913_vm0 = vcmask 1045504   ;;  %vm1909_vm1 = vcmask 228352   ;;  %vm3680_vm2 = vmmov 0  }
  0x57   : > { %3651 = vsyncadd (%p3981_p3), [#allocation6], 4294941440  ;;  %v3309_v1 = vld [vmem:[#allocation5 + $0xf8] sm:$0xff]   ;;  %2926 = vmatprep.subr.bf16.mxu0 %v3308_v0  ;;  %v3313_v5 = vld [vmem:[#allocation5 + $0xf0] sm:$0xff]   ;;  %s2714_s11 = sshll.u32 %s3841_s16, 4  ;;  %s2925_s29 = sshll.u32 %s3735_s22, 8 }
  0x58   : > { %v3310_v2 = vld [vmem:[#allocation5 + $0x38] sm:$0xff]   ;;  %2948 = vmatprep.subr.bf16.mxu1 %v3309_v1  ;;  %v3314_v6 = vld [vmem:[#allocation5 + $0x30] sm:$0xff]   ;;  %v3317_v9 = vld [vmem:[#allocation5 + $0xe8] sm:$0xff]   ;;  %s272_s12 = scalar_lea.vmem [#allocation8], %s2714_s11  ;;  %s3918_s13 = scalar_lea.hbm %s3966_s5, %s2925_s29 }
  0x59   : > { %v3311_v3 = vld [vmem:[#allocation5 + $0xb8] sm:$0xff]   ;;  %2927 = vmatpush3.bf16.msra.mxu0 %v3310_v2  ;;  %v3315_v7 = vld [vmem:[#allocation5 + $0xb0] sm:$0xff]   ;;  %v3318_v10 = vld [vmem:[#allocation5 + $0x28] sm:$0xff]   ;;  %s2611_s28 = sshll.u32 %s272_s12, 4  ;;  %s2598_s14 = scalar_lea.sflag [#allocation4], %s3841_s16  ;;  %s3913_s28 = int_to_ptr.vmem [resolvable:$true] %s2611_s28 }
  0x5a   : > { %2949 = vmatpush3.bf16.msra.mxu1 %v3311_v3  ;;  %2928 = vmatprep.subr.bf16.mxu0 %v3312_v4  ;;  %v3319_v11 = vld [vmem:[#allocation5 + $0xa8] sm:$0xff]   ;;  %v3320_v12 = vld [vmem:[#allocation5 + $0x60] sm:$0xff]   ;;  %v3324_v16 = vld [vmem:[#allocation5 + $0x58] sm:$0xff]   ;;  %s3602_s22 = scalar_lea.vmem %s3913_s28, 256  ;;  %p3982_p10 = scmp.ne.s32.totalorder %s3976_s23, 0 }
  0x5b   : > { %2950 = vmatprep.subr.bf16.mxu1 %v3313_v5  ;;  %v3321_v13 = vld [vmem:[#allocation5 + $0xe0] sm:$0xff]   ;;  %v3325_v17 = vld [vmem:[#allocation5 + $0xd8] sm:$0xff]   ;;  %v3328_v20 = vld [vmem:[#allocation5 + $0x50] sm:$0xff]   ;;  %p3603_p11 = scmp.ne.s32.totalorder %s3913_s28, %s3602_s22  ;;  %s3681_s17 = smov [#allocation8]  }
  0x5c   : > { %v3322_v14 = vld [vmem:[#allocation5 + $0x20] sm:$0xff]   ;;  %v3326_v18 = vld [vmem:[#allocation5 + $0x18] sm:$0xff]   ;;  %v3329_v21 = vld [vmem:[#allocation5 + $0xd0] sm:$0xff]   ;;  %s3606_s30 = sshll.u32 %s3681_s17, 4  ;;  %s3607_s30 = int_to_ptr.vmem [resolvable:$false] %s3606_s30 }
  0x5d   : > { %2929 = vmatpush3.bf16.msra.mxu0 %v3314_v6  ;;  %v3323_v15 = vld [vmem:[#allocation5 + $0xa0] sm:$0xff]   ;;  %v3327_v19 = vld [vmem:[#allocation5 + $0x98] sm:$0xff]   ;;  %v3330_v22 = vld [vmem:[#allocation5 + $0x10] sm:$0xff]   ;;  %p3604_p1 = pnand %p3603_p11, %p3982_p10  ;;  %p3609_p6 = scmp.lt.s32.totalorder %s3913_s28, %s3607_s30 }
  0x5e   : > { %2951 = vmatpush3.bf16.msra.mxu1 %v3315_v7  ;;  %2930 = vmatprep.subr.bf16.mxu0 %v3316_v8  ;;  %v3331_v23 = vld [vmem:[#allocation5 + $0x90] sm:$0xff]   ;;  %v3332_v24 = vld [vmem:[#allocation5 + $0x48] sm:$0xff]   ;;  %v3336_v28 = vld [vmem:[#allocation5 + $0x40] sm:$0xff]  }
  0x5f   : > { %2952 = vmatprep.subr.bf16.mxu1 %v3317_v9  ;;  %v3333_v25 = vld [vmem:[#allocation5 + $0xc8] sm:$0xff]   ;;  %v3337_v29 = vld [vmem:[#allocation5 + $0xc0] sm:$0xff]   ;;  %v3340_v44 = vld [vmem:[#allocation5 + $0x178] sm:$0xff]   ;;  %p3605_p2 = pneg %p3604_p1 }
  0x60   : > { %v3334_v26 = vld [vmem:[#allocation5 + $0x8] sm:$0xff]   ;;  %v3338_v30 = vld [vmem:[#allocation5] sm:$0xff]   ;;  %v3341_v45 = vld [vmem:[#allocation5 + $0x1f8] sm:$0xff]  }
  0x61   : > { %2931 = vmatpush3.bf16.msra.mxu0 %v3318_v10  ;;  %v3335_v27 = vld [vmem:[#allocation5 + $0x88] sm:$0xff]   ;;  %v3339_v31 = vld [vmem:[#allocation5 + $0x80] sm:$0xff]   ;;  %v3342_v46 = vld [vmem:[#allocation5 + $0x138] sm:$0xff]  }
  0x62   : > { %2953 = vmatpush3.bf16.msra.mxu1 %v3319_v11  ;;  %2932 = vmatprep.subr.bf16.mxu0 %v3320_v12  ;;  %v277_v32 = vld [vmem:[%s3845_s7 + $0x8] sm:$0xff]  ;;  %v302_v33 = vld [vmem:[%s3845_s7 + $0xd0] sm:$0xff]  ;;  %v279_v34 = vld [vmem:[%s3845_s7 + $0x18] sm:$0xff] }
  0x63   : > { %2954 = vmatprep.subr.bf16.mxu1 %v3321_v13  ;;  %v327_v35 = vpack.c.bf16 %v302_v33, %v277_v32  ;;  %v304_v36 = vld [vmem:[%s3845_s7 + $0xe0] sm:$0xff]  ;;  %v301_v38 = vld [vmem:[%s3845_s7 + $0xc8] sm:$0xff]  ;;  %v278_v41 = vld [vmem:[%s3845_s7 + $0x10] sm:$0xff] }
  0x64   : > { %v276_v37 = vld [vmem:[%s3845_s7] sm:$0xff]  ;;  %v329_v39 = vpack.c.bf16 %v304_v36, %v279_v34  ;;  %v303_v42 = vld [vmem:[%s3845_s7 + $0xd8] sm:$0xff]  ;;  %v281_v12 = vld [vmem:[%s3845_s7 + $0x28] sm:$0xff] }
  0x65   : > { %2933 = vmatpush3.bf16.msra.mxu0 %v3322_v14  ;;  %v326_v40 = vpack.c.bf16 %v301_v38, %v276_v37  ;;  %1949 = vmatprep.mubr.bf16.mxu0 %v327_v35  ;;  %v328_v43 = vpack.c.bf16 %v303_v42, %v278_v41  ;;  %v3343_v47 = vld [vmem:[#allocation5 + $0x1b8] sm:$0xff]   ;;  %v3344_v48 = vld [vmem:[#allocation5 + $0x170] sm:$0xff]   ;;  %v3348_v52 = vld [vmem:[#allocation5 + $0x168] sm:$0xff]  }
  0x66   : > { %2955 = vmatpush3.bf16.msra.mxu1 %v3323_v15  ;;  %2934 = vmatprep.subr.bf16.mxu0 %v3324_v16  ;;  %v3345_v49 = vld [vmem:[#allocation5 + $0x1f0] sm:$0xff]   ;;  %v3349_v53 = vld [vmem:[#allocation5 + $0x1e8] sm:$0xff]   ;;  %v3352_v56 = vld [vmem:[#allocation5 + $0x160] sm:$0xff]  }
  0x67   : > { %2956 = vmatprep.subr.bf16.mxu1 %v3325_v17  ;;  %1990 = vmatprep.mubr.bf16.mxu1 %v329_v39  ;;  %v3346_v50 = vld [vmem:[#allocation5 + $0x130] sm:$0xff]   ;;  %v3350_v54 = vld [vmem:[#allocation5 + $0x128] sm:$0xff]   ;;  %v3353_v57 = vld [vmem:[#allocation5 + $0x1e0] sm:$0xff]  }
  0x68   : > { %v3347_v51 = vld [vmem:[#allocation5 + $0x1b0] sm:$0xff]   ;;  %v3351_v55 = vld [vmem:[#allocation5 + $0x1a8] sm:$0xff]   ;;  %v3354_v58 = vld [vmem:[#allocation5 + $0x120] sm:$0xff]  }
  0x69   : > { %2935 = vmatpush3.bf16.msra.mxu0 %v3326_v18  ;;  %v3355_v59 = vld [vmem:[#allocation5 + $0x1a0] sm:$0xff]   ;;  %v3356_v60 = vld [vmem:[#allocation5 + $0x158] sm:$0xff]   ;;  %v3360_v0 = vld [vmem:[#allocation5 + $0x150] sm:$0xff]  }
  0x6a   : > { %2957 = vmatpush3.bf16.msra.mxu1 %v3327_v19  ;;  %2936 = vmatprep.subr.bf16.mxu0 %v3328_v20  ;;  %v3357_v61 = vld [vmem:[#allocation5 + $0x1d8] sm:$0xff]   ;;  %v3361_v1 = vld [vmem:[#allocation5 + $0x1d0] sm:$0xff]   ;;  %v3364_v4 = vld [vmem:[#allocation5 + $0x148] sm:$0xff]  }
  0x6b   : > { %2958 = vmatprep.subr.bf16.mxu1 %v3329_v21  ;;  %v3358_v62 = vld [vmem:[#allocation5 + $0x118] sm:$0xff]   ;;  %v3362_v2 = vld [vmem:[#allocation5 + $0x110] sm:$0xff]   ;;  %v3365_v5 = vld [vmem:[#allocation5 + $0x1c8] sm:$0xff]  }
  0x6c   : > { %v3359_v63 = vld [vmem:[#allocation5 + $0x198] sm:$0xff]   ;;  %v3363_v3 = vld [vmem:[#allocation5 + $0x190] sm:$0xff]   ;;  %v3366_v6 = vld [vmem:[#allocation5 + $0x108] sm:$0xff]  }
  0x6d   : > { %2937 = vmatpush3.bf16.msra.mxu0 %v3330_v22  ;;  %v3367_v7 = vld [vmem:[#allocation5 + $0x188] sm:$0xff]   ;;  %v3368_v8 = vld [vmem:[#allocation5 + $0x140] sm:$0xff]   ;;  %v3389_v41 = vld [vmem:[#allocation5 + $0x2d8] sm:$0xff]  }
  0x6e   : > { %2959 = vmatpush3.bf16.msra.mxu1 %v3331_v23  ;;  %2938 = vmatprep.subr.bf16.mxu0 %v3332_v24  ;;  %v3369_v9 = vld [vmem:[#allocation5 + $0x1c0] sm:$0xff]   ;;  %v283_v14 = vld [vmem:[%s3845_s7 + $0x38] sm:$0xff]  ;;  %v305_v19 = vld [vmem:[%s3845_s7 + $0xe8] sm:$0xff] }
  0x6f   : > { %2960 = vmatprep.subr.bf16.mxu1 %v3333_v25  ;;  %v3370_v10 = vld [vmem:[#allocation5 + $0x100] sm:$0xff]   ;;  %v307_v22 = vld [vmem:[%s3845_s7 + $0xf8] sm:$0xff] }
  0x70   : > { %v3371_v11 = vld [vmem:[#allocation5 + $0x180] sm:$0xff]   ;;  %v3372_v24 = vld [vmem:[#allocation5 + $0x278] sm:$0xff]   ;;  %v3380_v32 = vld [vmem:[#allocation5 + $0x268] sm:$0xff]  }
  0x71   : > { %2939 = vmatpush3.bf16.msra.mxu0 %v3334_v26  ;;  %v306_v13 = vld [vmem:[%s3845_s7 + $0xf0] sm:$0xff]  ;;  %v308_v15 = vld [vmem:[%s3845_s7 + $0x100] sm:$0xff]  ;;  %v3373_v25 = vld [vmem:[#allocation5 + $0x2f8] sm:$0xff]  }
  0x72   : > { %2961 = vmatpush3.bf16.msra.mxu1 %v3335_v27  ;;  %2940 = vmatprep.subr.bf16.mxu0 %v3336_v28  ;;  %v331_v16 = vpack.c.bf16 %v306_v13, %v281_v12  ;;  %v333_v17 = vpack.c.bf16 %v308_v15, %v283_v14  ;;  %v280_v18 = vld [vmem:[%s3845_s7 + $0x20] sm:$0xff]  ;;  %v282_v20 = vld [vmem:[%s3845_s7 + $0x30] sm:$0xff]  ;;  %v3374_v26 = vld [vmem:[#allocation5 + $0x238] sm:$0xff]  }
  0x73   : > { %2962 = vmatprep.subr.bf16.mxu1 %v3337_v29  ;;  %v330_v21 = vpack.c.bf16 %v305_v19, %v280_v18  ;;  %v332_v23 = vpack.c.bf16 %v307_v22, %v282_v20  ;;  %v3375_v27 = vld [vmem:[#allocation5 + $0x2b8] sm:$0xff]   ;;  %v3376_v28 = vld [vmem:[#allocation5 + $0x270] sm:$0xff]   ;;  %v3381_v33 = vld [vmem:[#allocation5 + $0x2e8] sm:$0xff]  }
  0x74   : > { %v3377_v29 = vld [vmem:[#allocation5 + $0x2f0] sm:$0xff]   ;;  %v3382_v34 = vld [vmem:[#allocation5 + $0x228] sm:$0xff]   ;;  %v3384_v36 = vld [vmem:[#allocation5 + $0x260] sm:$0xff]  }
  0x75   : > { %2941 = vmatpush3.bf16.msra.mxu0 %v3338_v30  ;;  %v3378_v30 = vld [vmem:[#allocation5 + $0x230] sm:$0xff]   ;;  %v3383_v35 = vld [vmem:[#allocation5 + $0x2a8] sm:$0xff]   ;;  %v3385_v37 = vld [vmem:[#allocation5 + $0x2e0] sm:$0xff]  }
  0x76   : > { %2963 = vmatpush3.bf16.msra.mxu1 %v3339_v31  ;;  %2970 = vmatprep.subr.bf16.mxu0 %v3340_v44  ;;  %v3379_v31 = vld [vmem:[#allocation5 + $0x2b0] sm:$0xff]   ;;  %v3386_v38 = vld [vmem:[#allocation5 + $0x220] sm:$0xff]   ;;  %v3390_v42 = vld [vmem:[#allocation5 + $0x218] sm:$0xff]  }
  0x77   : > { %2992 = vmatprep.subr.bf16.mxu1 %v3341_v45  ;;  %v3387_v39 = vld [vmem:[#allocation5 + $0x2a0] sm:$0xff]   ;;  %v3392_v44 = vld [vmem:[#allocation5 + $0x250] sm:$0xff]   ;;  %v3412_v12 = vld [vmem:[#allocation5 + $0x368] sm:$0xff]  }
  0x78   : > { %1950 = vmatmul.mubr.bf16.vlgmr.msra.gmra.mxu0 %v326_v40  ;;  %v3388_v40 = vld [vmem:[#allocation5 + $0x258] sm:$0xff]   ;;  %v3393_v45 = vld [vmem:[#allocation5 + $0x2d0] sm:$0xff]   ;;  %v3413_v13 = vld [vmem:[#allocation5 + $0x3e8] sm:$0xff]  }
  0x79   : > { %1991 = vmatmul.mubr.bf16.vlgmr.msra.gmra.mxu1 %v328_v43  ;;  %2971 = vmatpush3.bf16.msra.mxu0 %v3342_v46  ;;  %v3391_v43 = vld [vmem:[#allocation5 + $0x298] sm:$0xff]   ;;  %v3394_v46 = vld [vmem:[#allocation5 + $0x210] sm:$0xff]   ;;  %v3414_v14 = vld [vmem:[#allocation5 + $0x328] sm:$0xff]  }
  0x7a   : > { %2993 = vmatpush3.bf16.msra.mxu1 %v3343_v47  ;;  %2972 = vmatprep.subr.bf16.mxu0 %v3344_v48  ;;  %v3395_v47 = vld [vmem:[#allocation5 + $0x290] sm:$0xff]   ;;  %v3396_v48 = vld [vmem:[#allocation5 + $0x248] sm:$0xff]   ;;  %v3418_v18 = vld [vmem:[#allocation5 + $0x320] sm:$0xff]  }
  0x7b   : > { %2994 = vmatprep.subr.bf16.mxu1 %v3345_v49  ;;  %2031 = vmatprep.mubr.bf16.mxu0 %v331_v16  ;;  %v3397_v49 = vld [vmem:[#allocation5 + $0x2c8] sm:$0xff]   ;;  %v3416_v16 = vld [vmem:[#allocation5 + $0x360] sm:$0xff]   ;;  %v3420_v20 = vld [vmem:[#allocation5 + $0x358] sm:$0xff]  }
  0x7c   : > { %2072 = vmatprep.mubr.bf16.mxu1 %v333_v17  ;;  %v3415_v15 = vld [vmem:[#allocation5 + $0x3a8] sm:$0xff]   ;;  %v3417_v17 = vld [vmem:[#allocation5 + $0x3e0] sm:$0xff]   ;;  %v3422_v22 = vld [vmem:[#allocation5 + $0x318] sm:$0xff]  }
  0x7d   : > { %2973 = vmatpush3.bf16.msra.mxu0 %v3346_v50  ;;  %v3398_v50 = vld [vmem:[#allocation5 + $0x208] sm:$0xff]   ;;  %v3419_v19 = vld [vmem:[#allocation5 + $0x3a0] sm:$0xff]  }
  0x7e   : > { %2995 = vmatpush3.bf16.msra.mxu1 %v3347_v51  ;;  %2974 = vmatprep.subr.bf16.mxu0 %v3348_v52  ;;  %v3399_v51 = vld [vmem:[#allocation5 + $0x288] sm:$0xff]   ;;  %v3400_v52 = vld [vmem:[#allocation5 + $0x240] sm:$0xff]  }
  0x7f   : > { %2996 = vmatprep.subr.bf16.mxu1 %v3349_v53  ;;  %v3401_v53 = vld [vmem:[#allocation5 + $0x2c0] sm:$0xff]  }
  0x81   : > { %2975 = vmatpush3.bf16.msra.mxu0 %v3350_v54  ;;  %v3402_v54 = vld [vmem:[#allocation5 + $0x200] sm:$0xff]  }
  0x82   : > { %2997 = vmatpush3.bf16.msra.mxu1 %v3351_v55  ;;  %2976 = vmatprep.subr.bf16.mxu0 %v3352_v56  ;;  %v3403_v55 = vld [vmem:[#allocation5 + $0x280] sm:$0xff]   ;;  %v285_v56 = vld [vmem:[%s3845_s7 + $0x48] sm:$0xff] }
  0x83   : > { %2998 = vmatprep.subr.bf16.mxu1 %v3353_v57  ;;  %v310_v57 = vld [vmem:[%s3845_s7 + $0x110] sm:$0xff] }
  0x85   : > { %2977 = vmatpush3.bf16.msra.mxu0 %v3354_v58  ;;  %v335_v58 = vpack.c.bf16 %v310_v57, %v285_v56  ;;  %v3444_v56 = vld [vmem:[#allocation5 + $0x468] sm:$0xff]  }
  0x86   : > { %2999 = vmatpush3.bf16.msra.mxu1 %v3355_v59  ;;  %2978 = vmatprep.subr.bf16.mxu0 %v3356_v60  ;;  %v287_v59 = vld [vmem:[%s3845_s7 + $0x58] sm:$0xff]  ;;  %v312_v60 = vld [vmem:[%s3845_s7 + $0x120] sm:$0xff] }
  0x87   : > { %3000 = vmatprep.subr.bf16.mxu1 %v3357_v61  ;;  %v284_v61 = vld [vmem:[%s3845_s7 + $0x40] sm:$0xff]  ;;  %v3445_v57 = vld [vmem:[#allocation5 + $0x4e8] sm:$0xff]  }
  0x89   : > { %2979 = vmatpush3.bf16.msra.mxu0 %v3358_v62  ;;  %v337_v62 = vpack.c.bf16 %v312_v60, %v287_v59  ;;  %v3447_v59 = vld [vmem:[#allocation5 + $0x4a8] sm:$0xff]   ;;  %v3448_v60 = vld [vmem:[#allocation5 + $0x460] sm:$0xff]  }
  0x8a   : > { %3001 = vmatpush3.bf16.msra.mxu1 %v3359_v63  ;;  %2980 = vmatprep.subr.bf16.mxu0 %v3360_v0  ;;  %v309_v63 = vld [vmem:[%s3845_s7 + $0x108] sm:$0xff]  ;;  %v286_v0 = vld [vmem:[%s3845_s7 + $0x50] sm:$0xff] }
  0x8b   : > { %3002 = vmatprep.subr.bf16.mxu1 %v3361_v1  ;;  %v311_v1 = vld [vmem:[%s3845_s7 + $0x118] sm:$0xff] }
  0x8d   : > { %2981 = vmatpush3.bf16.msra.mxu0 %v3362_v2  ;;  %v334_v2 = vpack.c.bf16 %v309_v63, %v284_v61  ;;  %v3449_v61 = vld [vmem:[#allocation5 + $0x4e0] sm:$0xff]  }
  0x8e   : > { %3003 = vmatpush3.bf16.msra.mxu1 %v3363_v3  ;;  %2982 = vmatprep.subr.bf16.mxu0 %v3364_v4  ;;  %v336_v3 = vpack.c.bf16 %v311_v1, %v286_v0  ;;  %v3404_v4 = vld [vmem:[#allocation5 + $0x378] sm:$0xff]   ;;  %v3451_v63 = vld [vmem:[#allocation5 + $0x4a0] sm:$0xff]  }
  0x8f   : > { %3004 = vmatprep.subr.bf16.mxu1 %v3365_v5  ;;  %v3405_v5 = vld [vmem:[#allocation5 + $0x3f8] sm:$0xff]  }
  0x90   : > { %v3452_v0 = vld [vmem:[#allocation5 + $0x458] sm:$0xff]  }
  0x91   : > { %2983 = vmatpush3.bf16.msra.mxu0 %v3366_v6  ;;  %v3406_v6 = vld [vmem:[#allocation5 + $0x338] sm:$0xff]  }
  0x92   : > { %3005 = vmatpush3.bf16.msra.mxu1 %v3367_v7  ;;  %2984 = vmatprep.subr.bf16.mxu0 %v3368_v8  ;;  %v3407_v7 = vld [vmem:[#allocation5 + $0x3b8] sm:$0xff]   ;;  %v3408_v8 = vld [vmem:[#allocation5 + $0x370] sm:$0xff]  }
  0x93   : > { %3006 = vmatprep.subr.bf16.mxu1 %v3369_v9  ;;  %v3409_v9 = vld [vmem:[#allocation5 + $0x3f0] sm:$0xff]   ;;  %v3453_v1 = vld [vmem:[#allocation5 + $0x4d8] sm:$0xff]  }
  0x95   : > { %2985 = vmatpush3.bf16.msra.mxu0 %v3370_v10  ;;  %v3410_v10 = vld [vmem:[#allocation5 + $0x330] sm:$0xff]  }
  0x96   : > { %3007 = vmatpush3.bf16.msra.mxu1 %v3371_v11  ;;  %3014 = vmatprep.subr.bf16.mxu0 %v3372_v24  ;;  %v3411_v11 = vld [vmem:[#allocation5 + $0x3b0] sm:$0xff]  }
  0x97   : > { %3036 = vmatprep.subr.bf16.mxu1 %v3373_v25  ;;  %v3424_v24 = vld [vmem:[#allocation5 + $0x350] sm:$0xff]  }
  0x98   : > { %2032 = vmatmul.mubr.bf16.vlgmr.msra.gmra.mxu0 %v330_v21  ;;  %v3421_v21 = vld [vmem:[#allocation5 + $0x3d8] sm:$0xff]   ;;  %v3425_v25 = vld [vmem:[#allocation5 + $0x3d0] sm:$0xff]  }
  0x99   : > { %2073 = vmatmul.mubr.bf16.vlgmr.msra.gmra.mxu1 %v332_v23  ;;  %3015 = vmatpush3.bf16.msra.mxu0 %v3374_v26  ;;  %v3423_v23 = vld [vmem:[#allocation5 + $0x398] sm:$0xff]   ;;  %v3426_v26 = vld [vmem:[#allocation5 + $0x310] sm:$0xff]  }
  0x9a   : > { %3037 = vmatpush3.bf16.msra.mxu1 %v3375_v27  ;;  %3016 = vmatprep.subr.bf16.mxu0 %v3376_v28  ;;  %v3427_v27 = vld [vmem:[#allocation5 + $0x390] sm:$0xff]   ;;  %v3428_v28 = vld [vmem:[#allocation5 + $0x348] sm:$0xff]  }
  0x9b   : > { %3038 = vmatprep.subr.bf16.mxu1 %v3377_v29  ;;  %2113 = vmatprep.mubr.bf16.mxu0 %v335_v58  ;;  %v3429_v29 = vld [vmem:[#allocation5 + $0x3c8] sm:$0xff]  }
  0x9c   : > { %2154 = vmatprep.mubr.bf16.mxu1 %v337_v62  ;;  %v3446_v58 = vld [vmem:[#allocation5 + $0x428] sm:$0xff]   ;;  %v3450_v62 = vld [vmem:[#allocation5 + $0x420] sm:$0xff]  }
  0x9d   : > { %3017 = vmatpush3.bf16.msra.mxu0 %v3378_v30  ;;  %v3430_v30 = vld [vmem:[#allocation5 + $0x308] sm:$0xff]  }
  0x9e   : > { %3039 = vmatpush3.bf16.msra.mxu1 %v3379_v31  ;;  %3018 = vmatprep.subr.bf16.mxu0 %v3380_v32  ;;  %v3431_v31 = vld [vmem:[#allocation5 + $0x388] sm:$0xff]   ;;  %v3432_v32 = vld [vmem:[#allocation5 + $0x340] sm:$0xff]  }
  0x9f   : > { %3040 = vmatprep.subr.bf16.mxu1 %v3381_v33  ;;  %v3433_v33 = vld [vmem:[#allocation5 + $0x3c0] sm:$0xff]  }
  0xa1   : > { %3019 = vmatpush3.bf16.msra.mxu0 %v3382_v34  ;;  %v3434_v34 = vld [vmem:[#allocation5 + $0x300] sm:$0xff]  }
  0xa2   : > { %3041 = vmatpush3.bf16.msra.mxu1 %v3383_v35  ;;  %3020 = vmatprep.subr.bf16.mxu0 %v3384_v36  ;;  %v3435_v35 = vld [vmem:[#allocation5 + $0x380] sm:$0xff]   ;;  %v289_v36 = vld [vmem:[%s3845_s7 + $0x68] sm:$0xff] }
  0xa3   : > { %3042 = vmatprep.subr.bf16.mxu1 %v3385_v37  ;;  %v314_v37 = vld [vmem:[%s3845_s7 + $0x130] sm:$0xff] }
  0xa5   : > { %3021 = vmatpush3.bf16.msra.mxu0 %v3386_v38  ;;  %v291_v38 = vld [vmem:[%s3845_s7 + $0x78] sm:$0xff] }
  0xa6   : > { %3043 = vmatpush3.bf16.msra.mxu1 %v3387_v39  ;;  %3022 = vmatprep.subr.bf16.mxu0 %v3388_v40  ;;  %v339_v39 = vpack.c.bf16 %v314_v37, %v289_v36  ;;  %v316_v40 = vld [vmem:[%s3845_s7 + $0x140] sm:$0xff]  ;;  %v3476_v36 = vld [vmem:[#allocation5 + $0x568] sm:$0xff]  }
  0xa7   : > { %3044 = vmatprep.subr.bf16.mxu1 %v3389_v41  ;;  %v288_v41 = vld [vmem:[%s3845_s7 + $0x60] sm:$0xff]  ;;  %v3477_v37 = vld [vmem:[#allocation5 + $0x5e8] sm:$0xff]  }
  0xa9   : > { %3023 = vmatpush3.bf16.msra.mxu0 %v3390_v42  ;;  %v313_v42 = vld [vmem:[%s3845_s7 + $0x128] sm:$0xff] }
  0xaa   : > { %3045 = vmatpush3.bf16.msra.mxu1 %v3391_v43  ;;  %3024 = vmatprep.subr.bf16.mxu0 %v3392_v44  ;;  %v341_v43 = vpack.c.bf16 %v316_v40, %v291_v38  ;;  %v338_v44 = vpack.c.bf16 %v313_v42, %v288_v41  ;;  %v3478_v38 = vld [vmem:[#allocation5 + $0x528] sm:$0xff]   ;;  %v3480_v40 = vld [vmem:[#allocation5 + $0x560] sm:$0xff]  }
  0xab   : > { %3046 = vmatprep.subr.bf16.mxu1 %v3393_v45  ;;  %v290_v45 = vld [vmem:[%s3845_s7 + $0x70] sm:$0xff] }
  0xac   : > { %v3481_v41 = vld [vmem:[#allocation5 + $0x5e0] sm:$0xff]  }
  0xad   : > { %3025 = vmatpush3.bf16.msra.mxu0 %v3394_v46  ;;  %v315_v46 = vld [vmem:[%s3845_s7 + $0x138] sm:$0xff]  ;;  %v3482_v42 = vld [vmem:[#allocation5 + $0x520] sm:$0xff]  }
  0xae   : > { %3047 = vmatpush3.bf16.msra.mxu1 %v3395_v47  ;;  %3026 = vmatprep.subr.bf16.mxu0 %v3396_v48  ;;  %v340_v47 = vpack.c.bf16 %v315_v46, %v290_v45  ;;  %v3436_v48 = vld [vmem:[#allocation5 + $0x478] sm:$0xff]  }
  0xaf   : > { %3048 = vmatprep.subr.bf16.mxu1 %v3397_v49  ;;  %v3437_v49 = vld [vmem:[#allocation5 + $0x4f8] sm:$0xff]  }
  0xb0   : > { %v3485_v45 = vld [vmem:[#allocation5 + $0x5d8] sm:$0xff]  }
  0xb1   : > { %3027 = vmatpush3.bf16.msra.mxu0 %v3398_v50  ;;  %v3438_v50 = vld [vmem:[#allocation5 + $0x438] sm:$0xff]  }
  0xb2   : > { %3049 = vmatpush3.bf16.msra.mxu1 %v3399_v51  ;;  %3028 = vmatprep.subr.bf16.mxu0 %v3400_v52  ;;  %v3439_v51 = vld [vmem:[#allocation5 + $0x4b8] sm:$0xff]   ;;  %v3440_v52 = vld [vmem:[#allocation5 + $0x470] sm:$0xff]  }
  0xb3   : > { %3050 = vmatprep.subr.bf16.mxu1 %v3401_v53  ;;  %v3441_v53 = vld [vmem:[#allocation5 + $0x4f0] sm:$0xff]   ;;  %v3486_v46 = vld [vmem:[#allocation5 + $0x518] sm:$0xff]  }
  0xb5   : > { %3029 = vmatpush3.bf16.msra.mxu0 %v3402_v54  ;;  %v3442_v54 = vld [vmem:[#allocation5 + $0x430] sm:$0xff]  }
  0xb6   : > { %3051 = vmatpush3.bf16.msra.mxu1 %v3403_v55  ;;  %3058 = vmatprep.subr.bf16.mxu0 %v3404_v4  ;;  %v3443_v55 = vld [vmem:[#allocation5 + $0x4b0] sm:$0xff]  }
  0xb7   : > { %3080 = vmatprep.subr.bf16.mxu1 %v3405_v5  ;;  %v3456_v4 = vld [vmem:[#allocation5 + $0x450] sm:$0xff]  }
  0xb8   : > { %2114 = vmatmul.mubr.bf16.vlgmr.msra.gmra.mxu0 %v334_v2  ;;  %v3454_v2 = vld [vmem:[#allocation5 + $0x418] sm:$0xff]   ;;  %v3457_v5 = vld [vmem:[#allocation5 + $0x4d0] sm:$0xff]  }
  0xb9   : > { %2155 = vmatmul.mubr.bf16.vlgmr.msra.gmra.mxu1 %v336_v3  ;;  %3059 = vmatpush3.bf16.msra.mxu0 %v3406_v6  ;;  %v3455_v3 = vld [vmem:[#allocation5 + $0x498] sm:$0xff]   ;;  %v3458_v6 = vld [vmem:[#allocation5 + $0x410] sm:$0xff]  }
  0xba   : > { %3081 = vmatpush3.bf16.msra.mxu1 %v3407_v7  ;;  %3060 = vmatprep.subr.bf16.mxu0 %v3408_v8  ;;  %v3459_v7 = vld [vmem:[#allocation5 + $0x490] sm:$0xff]   ;;  %v3460_v8 = vld [vmem:[#allocation5 + $0x448] sm:$0xff]  }
  0xbb   : > { %3082 = vmatprep.subr.bf16.mxu1 %v3409_v9  ;;  %2195 = vmatprep.mubr.bf16.mxu0 %v339_v39  ;;  %v3461_v9 = vld [vmem:[#allocation5 + $0x4c8] sm:$0xff]  }
  0xbc   : > { %2236 = vmatprep.mubr.bf16.mxu1 %v341_v43  ;;  %v3479_v39 = vld [vmem:[#allocation5 + $0x5a8] sm:$0xff]   ;;  %v3483_v43 = vld [vmem:[#allocation5 + $0x5a0] sm:$0xff]  }
  0xbd   : > { %3061 = vmatpush3.bf16.msra.mxu0 %v3410_v10  ;;  %v3462_v10 = vld [vmem:[#allocation5 + $0x408] sm:$0xff]  }
  0xbe   : > { %3083 = vmatpush3.bf16.msra.mxu1 %v3411_v11  ;;  %3062 = vmatprep.subr.bf16.mxu0 %v3412_v12  ;;  %v3463_v11 = vld [vmem:[#allocation5 + $0x488] sm:$0xff]   ;;  %v3464_v12 = vld [vmem:[#allocation5 + $0x440] sm:$0xff]  }
  0xbf   : > { %3084 = vmatprep.subr.bf16.mxu1 %v3413_v13  ;;  %v3465_v13 = vld [vmem:[#allocation5 + $0x4c0] sm:$0xff]  }
  0xc1   : > { %3063 = vmatpush3.bf16.msra.mxu0 %v3414_v14  ;;  %v3466_v14 = vld [vmem:[#allocation5 + $0x400] sm:$0xff]  }
  0xc2   : > { %3085 = vmatpush3.bf16.msra.mxu1 %v3415_v15  ;;  %3064 = vmatprep.subr.bf16.mxu0 %v3416_v16  ;;  %v3467_v15 = vld [vmem:[#allocation5 + $0x480] sm:$0xff]   ;;  %v293_v16 = vld [vmem:[%s3845_s7 + $0x88] sm:$0xff] }
  0xc3   : > { %3086 = vmatprep.subr.bf16.mxu1 %v3417_v17  ;;  %v318_v17 = vld [vmem:[%s3845_s7 + $0x150] sm:$0xff] }
  0xc5   : > { %3065 = vmatpush3.bf16.msra.mxu0 %v3418_v18  ;;  %v295_v18 = vld [vmem:[%s3845_s7 + $0x98] sm:$0xff] }
  0xc6   : > { %3087 = vmatpush3.bf16.msra.mxu1 %v3419_v19  ;;  %3066 = vmatprep.subr.bf16.mxu0 %v3420_v20  ;;  %v320_v19 = vld [vmem:[%s3845_s7 + $0x160] sm:$0xff]  ;;  %v343_v20 = vpack.c.bf16 %v318_v17, %v293_v16  ;;  %v3504_v17 = vld [vmem:[#allocation7 + $0x28] sm:$0xff]  }
  0xc7   : > { %3088 = vmatprep.subr.bf16.mxu1 %v3421_v21  ;;  %v345_v21 = vpack.c.bf16 %v320_v19, %v295_v18  ;;  %v3503_v16 = vld [vmem:[#allocation7 + $0x30] sm:$0xff]   ;;  %v3505_v18 = vld [vmem:[#allocation7 + $0x20] sm:$0xff]   ;;  %v3506_v19 = vld [vmem:[#allocation7 + $0x18] sm:$0xff]  }
  0xc9   : > { %3067 = vmatpush3.bf16.msra.mxu0 %v3422_v22  ;;  %v292_v22 = vld [vmem:[%s3845_s7 + $0x80] sm:$0xff] }
  0xca   : > { %3089 = vmatpush3.bf16.msra.mxu1 %v3423_v23  ;;  %3068 = vmatprep.subr.bf16.mxu0 %v3424_v24  ;;  %v317_v23 = vld [vmem:[%s3845_s7 + $0x148] sm:$0xff]  ;;  %v294_v24 = vld [vmem:[%s3845_s7 + $0x90] sm:$0xff] }
  0xcb   : > { %3090 = vmatprep.subr.bf16.mxu1 %v3425_v25  ;;  %v342_v25 = vpack.c.bf16 %v317_v23, %v292_v22  ;;  %v3509_v22 = vld [vmem:[#allocation7] sm:$0xff]  }
  0xcd   : > { %3069 = vmatpush3.bf16.msra.mxu0 %v3426_v26  ;;  %v319_v26 = vld [vmem:[%s3845_s7 + $0x158] sm:$0xff] }
  0xce   : > { %3091 = vmatpush3.bf16.msra.mxu1 %v3427_v27  ;;  %3070 = vmatprep.subr.bf16.mxu0 %v3428_v28  ;;  %v344_v27 = vpack.c.bf16 %v319_v26, %v294_v24  ;;  %v3468_v28 = vld [vmem:[#allocation5 + $0x578] sm:$0xff]  }
  0xcf   : > { %3092 = vmatprep.subr.bf16.mxu1 %v3429_v29  ;;  %v3469_v29 = vld [vmem:[#allocation5 + $0x5f8] sm:$0xff]  }
  0xd1   : > { %3071 = vmatpush3.bf16.msra.mxu0 %v3430_v30  ;;  %v3470_v30 = vld [vmem:[#allocation5 + $0x538] sm:$0xff]  }
  0xd2   : > { %3093 = vmatpush3.bf16.msra.mxu1 %v3431_v31  ;;  %3072 = vmatprep.subr.bf16.mxu0 %v3432_v32  ;;  %v3471_v31 = vld [vmem:[#allocation5 + $0x5b8] sm:$0xff]   ;;  %v3472_v32 = vld [vmem:[#allocation5 + $0x570] sm:$0xff]  }
  0xd3   : > { %3094 = vmatprep.subr.bf16.mxu1 %v3433_v33  ;;  %v3473_v33 = vld [vmem:[#allocation5 + $0x5f0] sm:$0xff]  }
  0xd5   : > { %3073 = vmatpush3.bf16.msra.mxu0 %v3434_v34  ;;  %v3474_v34 = vld [vmem:[#allocation5 + $0x530] sm:$0xff]  }
  0xd6   : > { %3095 = vmatpush3.bf16.msra.mxu1 %v3435_v35  ;;  %3102 = vmatprep.subr.bf16.mxu0 %v3436_v48  ;;  %v3475_v35 = vld [vmem:[#allocation5 + $0x5b0] sm:$0xff]  }
  0xd7   : > { %3124 = vmatprep.subr.bf16.mxu1 %v3437_v49  ;;  %v3488_v48 = vld [vmem:[#allocation5 + $0x550] sm:$0xff]  }
  0xd8   : > { %2196 = vmatmul.mubr.bf16.vlgmr.msra.gmra.mxu0 %v338_v44  ;;  %v3484_v44 = vld [vmem:[#allocation5 + $0x558] sm:$0xff]   ;;  %v3489_v49 = vld [vmem:[#allocation5 + $0x5d0] sm:$0xff]  }
  0xd9   : > { %2237 = vmatmul.mubr.bf16.vlgmr.msra.gmra.mxu1 %v340_v47  ;;  %3103 = vmatpush3.bf16.msra.mxu0 %v3438_v50  ;;  %v3487_v47 = vld [vmem:[#allocation5 + $0x598] sm:$0xff]   ;;  %v3490_v50 = vld [vmem:[#allocation5 + $0x510] sm:$0xff]  }
  0xda   : > { %3125 = vmatpush3.bf16.msra.mxu1 %v3439_v51  ;;  %3104 = vmatprep.subr.bf16.mxu0 %v3440_v52  ;;  %v3491_v51 = vld [vmem:[#allocation5 + $0x590] sm:$0xff]   ;;  %v3492_v52 = vld [vmem:[#allocation5 + $0x548] sm:$0xff]  }
  0xdb   : > { %3126 = vmatprep.subr.bf16.mxu1 %v3441_v53  ;;  %2277 = vmatprep.mubr.bf16.mxu0 %v343_v20  ;;  %v3493_v53 = vld [vmem:[#allocation5 + $0x5c8] sm:$0xff]   ;;  %v3507_v20 = vld [vmem:[#allocation7 + $0x10] sm:$0xff]  }
  0xdc   : > { %2318 = vmatprep.mubr.bf16.mxu1 %v345_v21  ;;  %v3508_v21 = vld [vmem:[#allocation7 + $0x8] sm:$0xff]  }
  0xdd   : > { %3105 = vmatpush3.bf16.msra.mxu0 %v3442_v54  ;;  %v3494_v54 = vld [vmem:[#allocation5 + $0x508] sm:$0xff]  }
  0xde   : > { %3127 = vmatpush3.bf16.msra.mxu1 %v3443_v55  ;;  %3106 = vmatprep.subr.bf16.mxu0 %v3444_v56  ;;  %v3495_v55 = vld [vmem:[#allocation5 + $0x588] sm:$0xff]   ;;  %v3496_v56 = vld [vmem:[#allocation5 + $0x540] sm:$0xff]  }
  0xdf   : > { %3128 = vmatprep.subr.bf16.mxu1 %v3445_v57  ;;  %v3497_v57 = vld [vmem:[#allocation5 + $0x5c0] sm:$0xff]  }
  0xe1   : > { %3107 = vmatpush3.bf16.msra.mxu0 %v3446_v58  ;;  %v3498_v58 = vld [vmem:[#allocation5 + $0x500] sm:$0xff]  }
  0xe2   : > { %3129 = vmatpush3.bf16.msra.mxu1 %v3447_v59  ;;  %3108 = vmatprep.subr.bf16.mxu0 %v3448_v60  ;;  %v3499_v59 = vld [vmem:[#allocation5 + $0x580] sm:$0xff]   ;;  %v297_v60 = vld [vmem:[%s3845_s7 + $0xa8] sm:$0xff] }
  0xe3   : > { %3130 = vmatprep.subr.bf16.mxu1 %v3449_v61  ;;  %v322_v61 = vld [vmem:[%s3845_s7 + $0x170] sm:$0xff] }
  0xe5   : > { %3109 = vmatpush3.bf16.msra.mxu0 %v3450_v62  ;;  %v347_v62 = vpack.c.bf16 %v322_v61, %v297_v60 }
  0xe6   : > { %3131 = vmatpush3.bf16.msra.mxu1 %v3451_v63  ;;  %3110 = vmatprep.subr.bf16.mxu0 %v3452_v0  ;;  %v299_v63 = vld [vmem:[%s3845_s7 + $0xb8] sm:$0xff]  ;;  %v324_v0 = vld [vmem:[%s3845_s7 + $0x180] sm:$0xff] }
  0xe7   : > { %3132 = vmatprep.subr.bf16.mxu1 %v3453_v1  ;;  %v296_v1 = vld [vmem:[%s3845_s7 + $0xa0] sm:$0xff] }
  0xe9   : > { %3111 = vmatpush3.bf16.msra.mxu0 %v3454_v2  ;;  %v349_v2 = vpack.c.bf16 %v324_v0, %v299_v63 }
  0xea   : > { %3133 = vmatpush3.bf16.msra.mxu1 %v3455_v3  ;;  %3112 = vmatprep.subr.bf16.mxu0 %v3456_v4  ;;  %v321_v3 = vld [vmem:[%s3845_s7 + $0x168] sm:$0xff]  ;;  %v298_v4 = vld [vmem:[%s3845_s7 + $0xb0] sm:$0xff] }
  0xeb   : > { %3134 = vmatprep.subr.bf16.mxu1 %v3457_v5  ;;  %v323_v5 = vld [vmem:[%s3845_s7 + $0x178] sm:$0xff] }
  0xed   : > { %3113 = vmatpush3.bf16.msra.mxu0 %v3458_v6  ;;  %v3679_v6 = vmov 0.0  }
  0xee   : > { %3135 = vmatpush3.bf16.msra.mxu1 %v3459_v7  ;;  %3114 = vmatprep.subr.bf16.mxu0 %v3460_v8  ;;  %v346_v7 = vpack.c.bf16 %v321_v3, %v296_v1  ;;  %v348_v8 = vpack.c.bf16 %v323_v5, %v298_v4 }
  0xef   : > { %3136 = vmatprep.subr.bf16.mxu1 %v3461_v9  ;;  %v3500_v9 = vld [vmem:[#allocation5 + $0x608] sm:$0x3f]  }
  0xf1   : > { %3115 = vmatpush3.bf16.msra.mxu0 %v3462_v10  ;;  %v1915_v10 = vsel %vm1913_vm0, %v3500_v9, 0 }
  0xf2   : > { %3137 = vmatpush3.bf16.msra.mxu1 %v3463_v11  ;;  %3116 = vmatprep.subr.bf16.mxu0 %v3464_v12  ;;  %v3501_v11 = vld [vmem:[#allocation5 + $0x600] sm:$0xff]  }
  0xf3   : > { %3138 = vmatprep.subr.bf16.mxu1 %v3465_v13  ;;  %v300_v12 = vld [vmem:[%s3845_s7 + $0xc0] sm:$0xff]  ;;  %v325_v13 = vld [vmem:[%s3845_s7 + $0x188] sm:$0xff]  ;;  %s3608_s7 = scalar_lea.vmem %s3607_s30, 512 }
  0xf4   : > { %p3610_p12 = scmp.lt.s32.totalorder %s3608_s7, %s3602_s22 }
  0xf5   : > { %3117 = vmatpush3.bf16.msra.mxu0 %v3466_v14  ;;  %v350_v14 = vpack.c.bf16 %v325_v13, %v300_v12 }
  0xf6   : > { %3139 = vmatpush3.bf16.msra.mxu1 %v3467_v15  ;;  %3146 = vmatprep.subr.bf16.mxu0 %v3468_v28  ;;  %v3502_v15 = vld [vmem:[#allocation7 + $0x38] sm:$0xff]   ;;  %p3611_p7 = por %p3610_p12, %p3609_p6 }
  0xf7   : > { %3168 = vmatprep.subr.bf16.mxu1 %v3469_v29 }
  0xf8   : > { %2278 = vmatmul.mubr.bf16.vlgmr.msra.gmra.mxu0 %v342_v25  ;;  %p3612_p9 = pnand %p3611_p7, %p3605_p2 }
  0xf9   : > { %2319 = vmatmul.mubr.bf16.vlgmr.msra.gmra.mxu1 %v344_v27  ;;  %3147 = vmatpush3.bf16.msra.mxu0 %v3470_v30 }
  0xfa   : > { %3169 = vmatpush3.bf16.msra.mxu1 %v3471_v31  ;;  %3148 = vmatprep.subr.bf16.mxu0 %v3472_v32 }
  0xfb   : > { %3170 = vmatprep.subr.bf16.mxu1 %v3473_v33  ;;  %2359 = vmatprep.mubr.bf16.mxu0 %v347_v62 }
  0xfc   : > { %2400 = vmatprep.mubr.bf16.mxu1 %v349_v2 }
  0xfd   : > { %3149 = vmatpush3.bf16.msra.mxu0 %v3474_v34 }
  0xfe   : > { %3171 = vmatpush3.bf16.msra.mxu1 %v3475_v35  ;;  %3150 = vmatprep.subr.bf16.mxu0 %v3476_v36 }
  0xff   : > { %3172 = vmatprep.subr.bf16.mxu1 %v3477_v37 }
 0x101   : > { %3151 = vmatpush3.bf16.msra.mxu0 %v3478_v38 }
 0x102   : > { %3173 = vmatpush3.bf16.msra.mxu1 %v3479_v39  ;;  %3152 = vmatprep.subr.bf16.mxu0 %v3480_v40 }
 0x103   : > { %3174 = vmatprep.subr.bf16.mxu1 %v3481_v41 }
 0x105   : > { %3153 = vmatpush3.bf16.msra.mxu0 %v3482_v42 }
 0x106   : > { %3175 = vmatpush3.bf16.msra.mxu1 %v3483_v43  ;;  %3154 = vmatprep.subr.bf16.mxu0 %v3484_v44 }
 0x107   : > { %3176 = vmatprep.subr.bf16.mxu1 %v3485_v45 }
 0x109   : > { %3155 = vmatpush3.bf16.msra.mxu0 %v3486_v46 }
 0x10a   : > { %3177 = vmatpush3.bf16.msra.mxu1 %v3487_v47  ;;  %3156 = vmatprep.subr.bf16.mxu0 %v3488_v48 }
 0x10b   : > { %3178 = vmatprep.subr.bf16.mxu1 %v3489_v49  ;;  %v2715_v49 = vld [vmem:[%s3963_s2] ss:$0 sm:$0xff] }
 0x10d   : > { %3157 = vmatpush3.bf16.msra.mxu0 %v3490_v50 }
 0x10e   : > { %3179 = vmatpush3.bf16.msra.mxu1 %v3491_v51  ;;  %3158 = vmatprep.subr.bf16.mxu0 %v3492_v52 }
 0x10f   : > { %3180 = vmatprep.subr.bf16.mxu1 %v3493_v53 }
 0x111   : > { %3159 = vmatpush3.bf16.msra.mxu0 %v3494_v54 }
 0x112   : > { %3181 = vmatpush3.bf16.msra.mxu1 %v3495_v55  ;;  %3160 = vmatprep.subr.bf16.mxu0 %v3496_v56 }
 0x113   : > { %3182 = vmatprep.subr.bf16.mxu1 %v3497_v57 }
 0x115   : > { %3161 = vmatpush3.bf16.msra.mxu0 %v3498_v58 }
 0x116   : > { %3183 = vmatpush3.bf16.msra.mxu1 %v3499_v59  ;;  %3202 = vmatprep.subr.bf16.mxu0 %v3679_v6 }
 0x117   : > { %3210 = vmatprep.subr.bf16.mxu1 %v3679_v6 }
 0x118   : > { %2360 = vmatmul.mubr.bf16.vlgmr.msra.gmra.mxu0 %v346_v7 }
 0x119   : > { %2401 = vmatmul.mubr.bf16.vlgmr.msra.gmra.mxu1 %v348_v8  ;;  %3203 = vmatpush3.bf16.msra.mxu0 %v1915_v10 }
 0x11a   : > { %3206 = vmatprep.mubr.msk.bf16.mxu0 %vm3680_vm2, %v3679_v6  ;;  %3204 = vmatprep.subr.bf16.mxu0 %v3679_v6 }
 0x11b   : > { %3226 = vmatprep.mubr.msk.bf16.mxu1 %vm3680_vm2, %v3679_v6  ;;  %3211 = vmatpush3.bf16.msra.mxu1 %v3502_v15 }
 0x11c   : > { %3212 = vmatprep.subr.bf16.mxu1 %v3679_v6 }
 0x11d   : > { %3205 = vmatpush3.bf16.msra.mxu0 %v3501_v11 }
 0x11f   : > { %3213 = vmatpush3.bf16.msra.mxu1 %v3503_v16 }
 0x120   : > { %3207 = vmatmul.mubr.msk.bf16.vlgmr.msra.gmra.mxu0 %vm1909_vm1, %v350_v14  ;;  %3214 = vmatprep.subr.bf16.mxu1 %v3679_v6 }
 0x123   : > { %3215 = vmatpush3.bf16.msra.mxu1 %v3504_v17 }
 0x124   : > { %3216 = vmatprep.subr.bf16.mxu1 %v3679_v6 }
 0x127   : > { %3217 = vmatpush3.bf16.msra.mxu1 %v3505_v18 }
 0x128   : > { %3218 = vmatprep.subr.bf16.mxu1 %v3679_v6 }
 0x12b   : > { %3219 = vmatpush3.bf16.msra.mxu1 %v3506_v19 }
 0x12c   : > { %3220 = vmatprep.subr.bf16.mxu1 %v3679_v6 }
 0x12f   : > { %3221 = vmatpush3.bf16.msra.mxu1 %v3507_v20 }
 0x130   : > { %3222 = vmatprep.subr.bf16.mxu1 %v3679_v6 }
 0x133   : > { %3223 = vmatpush3.bf16.msra.mxu1 %v3508_v21 }
 0x134   : > { %3224 = vmatprep.subr.bf16.mxu1 %v3679_v6 }
 0x137   : > { %3225 = vmatpush3.bf16.msra.mxu1 %v3509_v22 }
 0x138   : > { %v2942_v23 = vpop.f32.mrf.mxu0 }
 0x139   : > { %v2964_v24 = vpop.f32.mrf.mxu1 }
 0x13a   : > { %v2943_v25 = vpop.f32.mrf.mxu0 }
 0x13b   : > { %v2965_v26 = vpop.f32.mrf.mxu1  ;;  %v2944_v48 = vadd.f32 %v2943_v25, %v2942_v23 }
 0x13c   : > { %v2945_v27 = vpop.f32.mrf.mxu0  ;;  %v2966_v53 = vadd.f32 %v2965_v26, %v2964_v24 }
 0x13d   : > { %v2967_v28 = vpop.f32.mrf.mxu1  ;;  %v1952_v52 = vadd.f32 %v2944_v48, %v2715_v49 }
 0x13e   : > { %v2946_v29 = vpop.f32.mrf.mxu0 }
 0x13f   : > { %v2968_v30 = vpop.f32.mrf.mxu1  ;;  %v2947_v54 = vadd.f32 %v2946_v29, %v2945_v27  ;;  %v1993_v58 = vadd.f32 %v2966_v53, %v1952_v52 }
 0x140   : > { %v2969_v61 = vadd.f32 %v2968_v30, %v2967_v28 }
 0x141   : > { %v1955_v59 = vadd.f32 %v2947_v54, %v2715_v49 }
 0x143   : > { %v1996_v2 = vadd.f32 %v2969_v61, %v1955_v59 }
 0x158   : > { %v2986_v31 = vpop.f32.mrf.mxu0 }
 0x159   : > { %v3008_v32 = vpop.f32.mrf.mxu1 }
 0x15a   : > { %v2987_v33 = vpop.f32.mrf.mxu0 }
 0x15b   : > { %v3009_v34 = vpop.f32.mrf.mxu1  ;;  %v2988_v56 = vadd.f32 %v2987_v33, %v2986_v31 }
 0x15c   : > { %v2989_v35 = vpop.f32.mrf.mxu0  ;;  %v3010_v63 = vadd.f32 %v3009_v34, %v3008_v32 }
 0x15d   : > { %v3011_v36 = vpop.f32.mrf.mxu1  ;;  %v2034_v62 = vadd.f32 %v2988_v56, %v1993_v58 }
 0x15e   : > { %v2990_v37 = vpop.f32.mrf.mxu0 }
 0x15f   : > { %v3012_v38 = vpop.f32.mrf.mxu1  ;;  %v2991_v0 = vadd.f32 %v2990_v37, %v2989_v35  ;;  %v2075_v6 = vadd.f32 %v3010_v63, %v2034_v62 }
 0x160   : > { %v3013_v9 = vadd.f32 %v3012_v38, %v3011_v36 }
 0x161   : > { %v2037_v7 = vadd.f32 %v2991_v0, %v1996_v2 }
 0x163   : > { %v2078_v14 = vadd.f32 %v3013_v9, %v2037_v7 }
 0x178   : > { %v3030_v39 = vpop.f32.mrf.mxu0 }
 0x179   : > { %v3052_v40 = vpop.f32.mrf.mxu1 }
 0x17a   : > { %v3031_v41 = vpop.f32.mrf.mxu0 }
 0x17b   : > { %v3053_v42 = vpop.f32.mrf.mxu1  ;;  %v3032_v3 = vadd.f32 %v3031_v41, %v3030_v39 }
 0x17c   : > { %v3033_v43 = vpop.f32.mrf.mxu0  ;;  %v3054_v11 = vadd.f32 %v3053_v42, %v3052_v40 }
 0x17d   : > { %v3055_v44 = vpop.f32.mrf.mxu1  ;;  %v2116_v10 = vadd.f32 %v3032_v3, %v2075_v6 }
 0x17e   : > { %v3034_v45 = vpop.f32.mrf.mxu0 }
 0x17f   : > { %v3056_v46 = vpop.f32.mrf.mxu1  ;;  %v3035_v12 = vadd.f32 %v3034_v45, %v3033_v43  ;;  %v2157_v17 = vadd.f32 %v3054_v11, %v2116_v10 }
 0x180   : > { %v3057_v20 = vadd.f32 %v3056_v46, %v3055_v44 }
 0x181   : > { %v2119_v18 = vadd.f32 %v3035_v12, %v2078_v14 }
 0x183   : > { %v2160_v25 = vadd.f32 %v3057_v20, %v2119_v18 }
 0x198   : > { %v3074_v47 = vpop.f32.mrf.mxu0 }
 0x199   : > { %v3096_v50 = vpop.f32.mrf.mxu1 }
 0x19a   : > { %v3075_v51 = vpop.f32.mrf.mxu0 }
 0x19b   : > { %v3097_v55 = vpop.f32.mrf.mxu1  ;;  %v3076_v15 = vadd.f32 %v3075_v51, %v3074_v47 }
 0x19c   : > { %v3077_v57 = vpop.f32.mrf.mxu0  ;;  %v3098_v22 = vadd.f32 %v3097_v55, %v3096_v50 }
 0x19d   : > { %v3099_v60 = vpop.f32.mrf.mxu1  ;;  %v2198_v21 = vadd.f32 %v3076_v15, %v2157_v17 }
 0x19e   : > { %v3078_v1 = vpop.f32.mrf.mxu0 }
 0x19f   : > { %v3100_v4 = vpop.f32.mrf.mxu1  ;;  %v3079_v23 = vadd.f32 %v3078_v1, %v3077_v57  ;;  %v2239_v28 = vadd.f32 %v3098_v22, %v2198_v21  ;;  %v2911_v1 = vld [vmem:[%s3965_s4] ss:$0 sm:$0xff] }
 0x1a0   : > { %v3101_v31 = vadd.f32 %v3100_v4, %v3099_v60 }
 0x1a1   : > { %v2201_v29 = vadd.f32 %v3079_v23, %v2160_v25 }
 0x1a3   : > { %v2242_v37 = vadd.f32 %v3101_v31, %v2201_v29 }
 0x1b8   : > { %v3118_v5 = vpop.f32.mrf.mxu0 }
 0x1b9   : > { %v3140_v8 = vpop.f32.mrf.mxu1 }
 0x1ba   : > { %v3119_v13 = vpop.f32.mrf.mxu0 }
 0x1bb   : > { %v3141_v16 = vpop.f32.mrf.mxu1  ;;  %v3120_v26 = vadd.f32 %v3119_v13, %v3118_v5 }
 0x1bc   : > { %v3121_v19 = vpop.f32.mrf.mxu0  ;;  %v3142_v33 = vadd.f32 %v3141_v16, %v3140_v8 }
 0x1bd   : > { %v3143_v24 = vpop.f32.mrf.mxu1  ;;  %v2280_v32 = vadd.f32 %v3120_v26, %v2239_v28 }
 0x1be   : > { %v3122_v27 = vpop.f32.mrf.mxu0 }
 0x1bf   : > { %v3144_v30 = vpop.f32.mrf.mxu1  ;;  %v3123_v34 = vadd.f32 %v3122_v27, %v3121_v19  ;;  %v2321_v40 = vadd.f32 %v3142_v33, %v2280_v32 }
 0x1c0   : > { %v3145_v45 = vadd.f32 %v3144_v30, %v3143_v24 }
 0x1c1   : > { %v2283_v41 = vadd.f32 %v3123_v34, %v2242_v37 }
 0x1c3   : > { %v2324_v50 = vadd.f32 %v3145_v45, %v2283_v41 }
 0x1d8   : > { %v3162_v35 = vpop.f32.mrf.mxu0 }
 0x1d9   : > { %v3184_v36 = vpop.f32.mrf.mxu1 }
 0x1da   : > { %v3163_v38 = vpop.f32.mrf.mxu0 }
 0x1db   : > { %v3185_v39 = vpop.f32.mrf.mxu1  ;;  %v3164_v42 = vadd.f32 %v3163_v38, %v3162_v35 }
 0x1dc   : > { %v3165_v43 = vpop.f32.mrf.mxu0  ;;  %v3186_v47 = vadd.f32 %v3185_v39, %v3184_v36 }
 0x1dd   : > { %v3187_v44 = vpop.f32.mrf.mxu1  ;;  %v2362_v46 = vadd.f32 %v3164_v42, %v2321_v40 }
 0x1de   : > { %v3166_v48 = vpop.f32.mrf.mxu0 }
 0x1df   : > { %v3188_v49 = vpop.f32.mrf.mxu1  ;;  %v3167_v51 = vadd.f32 %v3166_v48, %v3165_v43  ;;  %v2403_v52 = vadd.f32 %v3186_v47, %v2362_v46 }
 0x1e0   : > { %v2443_v53 = vpop.f32.mrf.mxu0  ;;  %v3189_v55 = vadd.f32 %v3188_v49, %v3187_v44 }
 0x1e1   : > { %v2365_v54 = vadd.f32 %v3167_v51, %v2324_v50  ;;  %v2444_v56 = vadd.f32 %v2443_v53, %v2403_v52 }
 0x1e2   : > { %v3208_v57 = vpop.f32.mrf.mxu0 }
 0x1e3   : > { %v2406_v58 = vadd.f32 %v3189_v55, %v2365_v54  ;;  %3510 = vtanh.f32 %v2444_v56 }
 0x1e4   : > { %v2446_v59 = vpop.f32.mrf.mxu0 }
 0x1e5   : > { %v2447_v60 = vadd.f32 %v2446_v59, %v2406_v58 }
 0x1e6   : > { %v3209_v61 = vpop.f32.mrf.mxu0 }
 0x1e7   : > { %3512 = vtanh.f32 %v2447_v60 }
 0x1f0   : > { %v3511_v62 = vpop.eup %3510 }
 0x1f4   : > { %v3513_v63 = vpop.eup %3512 }
 0x1f5   : > { %v2452_v0 = vpack.c.bf16 %v3513_v63, %v3511_v62 }
 0x1f7   : > { %3227 = vmatmul.mubr.bf16.vlgmr.msra.gmra.mxu1 %v2452_v0 }
 0x2b7   : > { %v2558_v2 = vpop.f32.mrf.mxu1 }
 0x2b8   : > { %v2559_v3 = vadd.f32 %v2911_v1, %v2558_v2 }
 0x2b9   : > { %v3228_v4 = vpop.f32.mrf.mxu1 }
 0x2ba   : > { %v2567_v5 = vand.u32 2147483647, %v2559_v3  ;;  %v2565_v26 = vmax.f32 %v2559_v3, 0.0 }
 0x2bb   : > { %v2561_v6 = vpop.f32.mrf.mxu1 }
 0x2bc   : > { %v2569_v7 = vsub.f32 0.0, %v2567_v5  ;;  %v2562_v8 = vadd.f32 %v2911_v1, %v2561_v6 }
 0x2bd   : > { %v3229_v9 = vpop.f32.mrf.mxu1 }
 0x2be   : > { %v2571_v10 = vmul.f32 1.442695, %v2569_v7  ;;  %v2568_v11 = vand.u32 2147483647, %v2562_v8  ;;  %v2566_v33 = vmax.f32 %v2562_v8, 0.0 }
 0x2c0   : > { %3514 = vpow2.f32 %v2571_v10  ;;  %v2570_v12 = vsub.f32 0.0, %v2568_v11 }
 0x2c2   : > { %v2573_v13 = vmul.f32 1.442695, %v2570_v12 }
 0x2c4   : > { %3516 = vpow2.f32 %v2573_v13 }
 0x2cd   : > { %v3515_v14 = vpop.eup %3514 }
 0x2ce   : > { %v2575_v15 = vadd.f32 1.0, %v3515_v14  ;;  %v2578_v18 = vmul.f32 -0.5, %v3515_v14  ;;  %v2581_v21 = vand.u32 2147483647, %v3515_v14 }
 0x2d0   : > { %3518 = vlog2.f32 %v2575_v15  ;;  %v2579_v19 = vadd.f32 1.0, %v2578_v18  ;;  %vm2582_vm3 = vcmp.lt.f32.partialorder %v2581_v21, 0.0004427343 }
 0x2d1   : > { %v3517_v16 = vpop.eup %3516 }
 0x2d2   : > { %v2584_v17 = vadd.f32 1.0, %v3517_v16  ;;  %v2587_v20 = vmul.f32 -0.5, %v3517_v16  ;;  %v2580_v24 = vmul.f32 %v3515_v14, %v2579_v19  ;;  %v2590_v27 = vand.u32 2147483647, %v3517_v16 }
 0x2d4   : > { %3520 = vlog2.f32 %v2584_v17  ;;  %v2588_v25 = vadd.f32 1.0, %v2587_v20  ;;  %vm2591_vm4 = vcmp.lt.f32.partialorder %v2590_v27, 0.0004427343 }
 0x2d6   : > { %v2589_v32 = vmul.f32 %v3517_v16, %v2588_v25 }
 0x2dd   : > { %v3519_v22 = vpop.eup %3518 }
 0x2de   : > { %v2577_v23 = vmul.f32 0.6931472, %v3519_v22 }
 0x2e0   : > { %v2583_v28 = vsel %vm2582_vm3, %v2580_v24, %v2577_v23 }
 0x2e1   : > { %v3521_v29 = vpop.eup %3520  ;;  %v2593_v30 = vadd.f32 %v2583_v28, %v2565_v26 }
 0x2e2   : > { %v2586_v31 = vmul.f32 0.6931472, %v3521_v29 }
 0x2e3   : > { %2595 = vst [vmem:[%s272_s12] sm:$0xff] %v2593_v30 }
 0x2e4   : > { %v2592_v34 = vsel %vm2591_vm4, %v2589_v32, %v2586_v31 }
 0x2e5   : > { %v2594_v35 = vadd.f32 %v2592_v34, %v2566_v33 }
 0x2e7   : > { %2596 = vst [vmem:[%s272_s12 + $0x8] sm:$0xff] %v2594_v35 }
 0x2e8   : > { %3615 = shalt.err (!%p3612_p9)
}
 0x2e9   : > { %s3616_s24 = scalar_lea.hbm %s3918_s13, 256  ;;  %s3620_s9 = scalar_lea.hbm %s3966_s5, 512 }
 0x2ea   : > { %p3617_p13 = scmp.ne.s32.totalorder %s3918_s13, %s3616_s24  ;;  %p3621_p4 = scmp.lt.s32.totalorder %s3918_s13, %s3966_s5 }
 0x2eb   : > { %p3622_p8 = scmp.lt.s32.totalorder %s3620_s9, %s3616_s24 }
 0x2ec   : > { %p3618_p5 = pnand %p3617_p13, %p3982_p10 }
 0x2ed   : > { %p3623_p3 = por %p3622_p8, %p3621_p4 }
 0x2ee   : > { %p3619_p0 = pneg %p3618_p5 }
 0x2f0   : > { %p3624_p11 = pnand %p3623_p3, %p3619_p0 }
 0x2f2   : > { %3627 = shalt.err (!%p3624_p11)
}
 0x2f3   : > { %s3682_s29 = smov 128   ;;  %s3683_s8 = smov 8  }
 0x2f4   : > { %3243 = dma.vmem_to_hbm [thread:$0]  (%p3982_p10), %s3913_s28, 256, %s3918_s13, %s2598_s14, %s3682_s29, %s3682_s29, %s3683_s8  }
 0x2f5 PF: > { %s2626_s10 = sand.u32 1, %s3658_s18   ;;  %p3983_p1 = scmp.ne.s32.totalorder %s3972_s25, 0 }
 0x2f6   : > { %p3984_p2 = scmp.ge.s32.totalorder %s3670_s21, 2  ;;  %s2627_s22 = scalar_lea.sflag [#allocation4], %s2626_s10 }
 0x2f8   : > { %p3257_p6 = pnand %p3984_p2, %p3983_p1 }
 0x2fa   : > { %p3258_p12 = pneg %p3257_p6 }
 0x2fc   : > { %3653 = dma.done.wait (%p3258_p12), %s2627_s22, 256  }
 0x2fd   : > { %3655 = vsyncadd (%p3258_p12), %s2627_s22, 4294967040  ;;  %p19_p7 = scmp.ge.s32.totalorder %s3786_s15, 4   ;;  %s3985_s18 = smov %s3662_s19 }
 0x2fe   : > { %s3986_s19 = smov %s3666_s20  ;;  %s3987_s20 = smov %s3802_s27 }
 0x2ff   : > { %s3988_s21 = smov %s3786_s15  ;;  %21 = sbr.rel (!%p19_p7) target bundleno = 6 (0x6), region = 93 }
 0x304   :  { %2632 = vsyncpa [#allocation3], 1 }
 0x305   :  { %2634 = vsyncpa [#allocation3 + $0x1], 1 }
 0x306   :  { %2635 = vsyncpa [#allocation6], 1 }
 0x307   :  { %2636 = vsyncpa [#allocation4], 1 }
 0x308   :  { %2638 = vsyncpa [#allocation4 + $0x1], 1 }

</bundles_post_ra>
